<compile_context>
chip_gen: v5e
topology: v5e:2x2
jax: 0.10.0
libtpu: 0.0.40
codegen_flags: <defaults>
</compile_context>

<pallas_src>
import functools

import jax
import jax.numpy as jnp
from jax import lax
from jax.experimental import pallas as pl
from jax.experimental.pallas import tpu as pltpu


def _round_up(x, m):
    return (x + m - 1) // m * m


def _pad2(a, rows, cols, dtype):
    a = a.astype(jnp.float32)
    a = jnp.pad(a, ((0, rows - a.shape[0]), (0, cols - a.shape[1])))
    return a.astype(dtype)


def _vmem_capacity_bytes(default=64 << 20):
    try:
        info = pltpu.get_tpu_info()
        return int(getattr(info, "vmem_capacity_bytes", default))
    except Exception:
        return default


def _sigmoid(x):
    # sigmoid(x) == 0.5*(1 + tanh(0.5*x)): exact identity, one EUP op (tanh)
    # instead of exp + reciprocal.
    return 0.5 * (1.0 + jnp.tanh(0.5 * x))


def _rnn_pool_kernel(x_ref, wfz_ref, bfz_ref, wo_ref, bo_ref,
                     w0_ref, b0_ref, w1_ref, b1_ref, w2_ref, b2_ref,
                     out_ref, c_ref, proj_ref,
                     *, seq_len, unroll):
    si = pl.program_id(1)
    n_si = pl.num_programs(1)

    TS, TB, Din = x_ref.shape
    Mp = wo_ref.shape[1]

    # --- init the carried cell state once per batch tile ---------------------
    @pl.when(si == 0)
    def _init():
        c_ref[...] = jnp.zeros_like(c_ref)

    # (TS, TB, Din) -> (TS*TB, Din). TB is a multiple of 16, so this flatten is
    # layout-preserving; rows of timestep t are the contiguous sublane block
    # [t*TB, (t+1)*TB).
    x = x_ref[...].reshape(TS * TB, Din)

    # Fused lane-dense f/z projection: one big MXU matmul (M = TS*TB,
    # N = 2*Mp), f32 accumulation, bias add, then staged once as bf16
    # pre-activations.  The nonlinearities run per-timestep in the recurrence,
    # removing the old extra f32 store/reload pass over the gates.
    proj = jnp.dot(x, wfz_ref[...], preferred_element_type=jnp.float32) + bfz_ref[...]
    proj_ref[...] = proj.astype(proj_ref.dtype)

    has_pad = (seq_len % TS) != 0  # static

    def step(t, c):
        r = pl.multiple_of(t * TB, TB)
        p = proj_ref[pl.ds(r, TB), :].astype(jnp.float32)   # (TB, 2*Mp)
        f = _sigmoid(p[:, :Mp])
        z = (1.0 - f) * jnp.tanh(p[:, Mp:])
        c_new = f * c + z
        if has_pad:
            # Padded timesteps (global index >= seq_len) leave c unchanged.
            c_new = jnp.where(si * TS + t < seq_len, c_new, c)
        return c_new

    c = lax.fori_loop(0, TS, step, c_ref[...], unroll=unroll)

    # Keep the carry in VMEM only when another seq tile follows.
    @pl.when(si != n_si - 1)
    def _save():
        c_ref[...] = c

    # --- epilogue: o-gate at the TRUE final timestep + MLP head --------------
    last_local = (seq_len - 1) % TS  # static; always lands in the last seq tile

    @pl.when(si == n_si - 1)
    def _finish():
        x_last = x_ref[last_local]                           # (TB, Din)
        o = _sigmoid(
            jnp.dot(x_last, wo_ref[...], preferred_element_type=jnp.float32)
            + bo_ref[...])
        hn = c * o                                           # (TB, Mp) f32
        # F.dropout is identity in eval mode.
        h0 = jnp.maximum(
            jnp.dot(hn.astype(w0_ref.dtype), w0_ref[...],
                    preferred_element_type=jnp.float32) + b0_ref[...], 0.0)
        h1 = jnp.maximum(
            jnp.dot(h0.astype(w1_ref.dtype), w1_ref[...],
                    preferred_element_type=jnp.float32) + b1_ref[...], 0.0)
        out_ref[...] = (
            jnp.dot(h1.astype(w2_ref.dtype), w2_ref[...],
                    preferred_element_type=jnp.float32) + b2_ref[...])


def rnn_pool(x, params, *, compute_dtype=jnp.bfloat16, batch_tile=128,
             seq_tile=64, stage_dtype=jnp.bfloat16):
    B, S, Din = x.shape
    M = params["wf"].shape[1]
    H = params["w0"].shape[1]
    C = params["w2"].shape[1]

    LANE = 128
    SUB = 16   # multiple of bf16 sublane pack (16) and f32 tile (8)

    Mp = _round_up(M, LANE)
    Hp = _round_up(H, LANE)
    Cp = _round_up(C, LANE)

    f32 = jnp.float32
    cd = compute_dtype

    # Batch tile: multiple of 16; aim for >= 2 batch tiles so the "parallel"
    # grid axis can shard across v7x's two TensorCores.
    TB = _round_up(min(batch_tile, max(SUB, -(-B // 2))), SUB)
    Bp = _round_up(B, TB)

    # VMEM-aware seq tile: keep the proj scratch + double-buffered x inside a
    # chip-appropriate budget (v7x: 64 MiB/TC, v5e/v6e: 128 MiB).
    vmem_cap = _vmem_capacity_bytes()
    vmem_limit = int(min(vmem_cap * 3 // 4, 112 << 20))
    stage_b = jnp.dtype(stage_dtype).itemsize
    cd_b = jnp.dtype(cd).itemsize
    w_bytes = cd_b * (Din * 3 * Mp + Mp * Hp + Hp * Hp + Hp * Cp)
    b_bytes = 4 * (3 * Mp + 2 * Hp + Cp)
    fixed = 2 * (w_bytes + b_bytes) + 2 * TB * Cp * 4 + TB * Mp * 4
    per_ts = TB * (2 * Mp * stage_b + 2 * Din * cd_b)   # proj scratch + 2x-buffered x rows
    budget = max(int(vmem_limit * 0.7) - fixed, per_ts)
    TS = max(1, min(seq_tile, S, budget // per_ts))
    Sp = _round_up(S, TS)

    # Partial unroll of the recurrence (keep it a divisor of TS for simplicity).
    unroll = 8 if TS % 8 == 0 else (4 if TS % 4 == 0 else (2 if TS % 2 == 0 else 1))

    # Fused + lane-padded f/z projection; separate o-gate weights (o is only
    # needed at the final timestep).  Zero-padding is exact: padded lanes give
    # f=0.5, z=0 -> c stays 0 -> hn=0 -> no contribution downstream.
    wfz = jnp.concatenate([_pad2(params["wf"], Din, Mp, cd),
                           _pad2(params["wz"], Din, Mp, cd)], axis=1)
    bfz = jnp.concatenate([_pad2(params["bf"], 1, Mp, f32),
                           _pad2(params["bz"], 1, Mp, f32)], axis=1)
    wo = _pad2(params["wo"], Din, Mp, cd)
    bo = _pad2(params["bo"], 1, Mp, f32)
    w0 = _pad2(params["w0"], Mp, Hp, cd)
    b0 = _pad2(params["b0"], 1, Hp, f32)
    w1 = _pad2(params["w1"], Hp, Hp, cd)
    b1 = _pad2(params["b1"], 1, Hp, f32)
    w2 = _pad2(params["w2"], Hp, Cp, cd)
    b2 = _pad2(params["b2"], 1, Cp, f32)

    # Time-major, batch- and seq-padded input (layout plumbing stays in the
    # wrapper).  Padded timesteps are masked in-kernel; padded batch rows are
    # sliced off below.
    xt = jnp.transpose(x, (1, 0, 2))                        # (S, B, Din)
    xt = jnp.pad(xt, ((0, Sp - S), (0, Bp - B), (0, 0))).astype(cd)

    grid = (Bp // TB, Sp // TS)

    def wspec(r, c):
        return pl.BlockSpec((r, c), lambda bi, si: (0, 0))

    kernel = functools.partial(_rnn_pool_kernel, seq_len=S, unroll=unroll)

    out = pl.pallas_call(
        kernel,
        out_shape=jax.ShapeDtypeStruct((Bp, Cp), jnp.float32),
        grid_spec=pltpu.PrefetchScalarGridSpec(
            num_scalar_prefetch=0,
            grid=grid,
            in_specs=[
                pl.BlockSpec((TS, TB, Din), lambda bi, si: (si, bi, 0)),
                wspec(Din, 2 * Mp), wspec(1, 2 * Mp),
                wspec(Din, Mp), wspec(1, Mp),
                wspec(Mp, Hp), wspec(1, Hp),
                wspec(Hp, Hp), wspec(1, Hp),
                wspec(Hp, Cp), wspec(1, Cp),
            ],
            out_specs=pl.BlockSpec((TB, Cp), lambda bi, si: (bi, 0)),
            scratch_shapes=[
                pltpu.VMEM((TB, Mp), jnp.float32),          # carried cell state c
                pltpu.VMEM((TS * TB, 2 * Mp), stage_dtype),  # staged f/z pre-activations
            ]),
        compiler_params=pltpu.CompilerParams(
            dimension_semantics=("parallel", "arbitrary"),
            vmem_limit_bytes=vmem_limit),
    )(xt, wfz, bfz, wo, bo, w0, b0, w1, b1, w2, b2)

    return out[:B, :C]


def rnn_pool_reference(x, p):
    """Pure-JAX f32 reference matching the PyTorch forward (eval mode)."""
    f = jax.nn.sigmoid(x @ p["wf"] + p["bf"])
    z = (1.0 - f) * jnp.tanh(x @ p["wz"] + p["bz"])
    o = jax.nn.sigmoid(x @ p["wo"] + p["bo"])
    B, S, M = f.shape
    c = jnp.zeros((B, M), jnp.float32)
    for t in range(S):
        c = f[:, t, :] * c + z[:, t, :]
    hn = c * o[:, -1, :]
    hn = jnp.maximum(hn @ p["w0"] + p["b0"], 0.0)
    hn = jnp.maximum(hn @ p["w1"] + p["b1"], 0.0)
    return hn @ p["w2"] + p["b2"]


def init_params(key, inp_dim, model_dim, mlp_dim, num_classes):
    ks = jax.random.split(key, 12)
    s = 0.1
    return {
        # projection Linear(inp_dim, 3*model_dim) split into its f/z/o chunks
        "wf": s * jax.random.normal(ks[0], (inp_dim, model_dim), jnp.float32),
        "bf": s * jax.random.normal(ks[1], (1, model_dim), jnp.float32),
        "wz": s * jax.random.normal(ks[2], (inp_dim, model_dim), jnp.float32),
        "bz": s * jax.random.normal(ks[3], (1, model_dim), jnp.float32),
        "wo": s * jax.random.normal(ks[4], (inp_dim, model_dim), jnp.float32),
        "bo": s * jax.random.normal(ks[5], (1, model_dim), jnp.float32),
        # MLP head
        "w0": s * jax.random.normal(ks[6], (model_dim, mlp_dim), jnp.float32),
        "b0": s * jax.random.normal(ks[7], (1, mlp_dim), jnp.float32),
        "w1": s * jax.random.normal(ks[8], (mlp_dim, mlp_dim), jnp.float32),
        "b1": s * jax.random.normal(ks[9], (1, mlp_dim), jnp.float32),
        "w2": s * jax.random.normal(ks[10], (mlp_dim, num_classes), jnp.float32),
        "b2": s * jax.random.normal(ks[11], (1, num_classes), jnp.float32),
    }


if __name__ == "__main__":
    B, S, inp_dim = 2, 8, 16
    model_dim, mlp_dim, num_classes = 32, 32, 4

    key = jax.random.PRNGKey(0)
    k_x, k_p = jax.random.split(key)
    x = jax.random.normal(k_x, (B, S, inp_dim), jnp.float32)
    params = init_params(k_p, inp_dim, model_dim, mlp_dim, num_classes)

    out = jax.block_until_ready(rnn_pool(x, params))
    ref = jax.block_until_ready(rnn_pool_reference(x, params))

    assert out.shape == (B, num_classes), out.shape
    # bf16 matmul operands / bf16-staged pre-activations with f32 math ->
    # compare against the f32 reference at bf16-level tolerance.
    assert jnp.allclose(out, ref, atol=2e-2, rtol=2e-2), (out, ref)
    print("KERNEL_OK")
</pallas_src>

<mosaic_0001>
module attributes {stable_mosaic.version = 11 : i64} {
  func.func @_rnn_pool_kernel(%arg0: i32, %arg1: i32, %arg2: memref<8x16x16xbf16, #tpu.memory_space<vmem>>, %arg3: memref<16x256xbf16, #tpu.memory_space<vmem>>, %arg4: memref<1x256xf32, #tpu.memory_space<vmem>>, %arg5: memref<16x128xbf16, #tpu.memory_space<vmem>>, %arg6: memref<1x128xf32, #tpu.memory_space<vmem>>, %arg7: memref<128x128xbf16, #tpu.memory_space<vmem>>, %arg8: memref<1x128xf32, #tpu.memory_space<vmem>>, %arg9: memref<128x128xbf16, #tpu.memory_space<vmem>>, %arg10: memref<1x128xf32, #tpu.memory_space<vmem>>, %arg11: memref<128x128xbf16, #tpu.memory_space<vmem>>, %arg12: memref<1x128xf32, #tpu.memory_space<vmem>>, %arg13: memref<16x128xf32, #tpu.memory_space<vmem>>, %arg14: memref<16x128xf32, #tpu.memory_space<vmem>>, %arg15: memref<128x256xbf16, #tpu.memory_space<vmem>>) attributes {dimension_semantics = [#tpu.dimension_semantics<parallel>, #tpu.dimension_semantics<arbitrary>], iteration_bounds = array<i64: 1, 1>, scalar_prefetch = 0 : i64, scratch_operands = 2 : i64, tpu.core_type = #tpu.core_type<tc>, window_params = [{transform_indices = @transform_0, window_bounds = array<i64: 8, 16, 16>}, {pipeline_mode = #tpu.pipeline_mode<synchronous>, transform_indices = @transform_1, window_bounds = array<i64: 16, 256>}, {pipeline_mode = #tpu.pipeline_mode<synchronous>, transform_indices = @transform_2, window_bounds = array<i64: 1, 256>}, {pipeline_mode = #tpu.pipeline_mode<synchronous>, transform_indices = @transform_3, window_bounds = array<i64: 16, 128>}, {pipeline_mode = #tpu.pipeline_mode<synchronous>, transform_indices = @transform_4, window_bounds = array<i64: 1, 128>}, {pipeline_mode = #tpu.pipeline_mode<synchronous>, transform_indices = @transform_5, window_bounds = array<i64: 128, 128>}, {pipeline_mode = #tpu.pipeline_mode<synchronous>, transform_indices = @transform_6, window_bounds = array<i64: 1, 128>}, {pipeline_mode = #tpu.pipeline_mode<synchronous>, transform_indices = @transform_7, window_bounds = array<i64: 128, 128>}, {pipeline_mode = #tpu.pipeline_mode<synchronous>, transform_indices = @transform_8, window_bounds = array<i64: 1, 128>}, {pipeline_mode = #tpu.pipeline_mode<synchronous>, transform_indices = @transform_9, window_bounds = array<i64: 128, 128>}, {pipeline_mode = #tpu.pipeline_mode<synchronous>, transform_indices = @transform_10, window_bounds = array<i64: 1, 128>}, {transform_indices = @transform_11, window_bounds = array<i64: 16, 128>}]} {
    %c0_i32 = arith.constant 0 : i32
    %0 = arith.cmpi eq, %arg1, %c0_i32 : i32
    %1 = arith.extui %0 : i1 to i32
    %c0_i32_0 = arith.constant 0 : i32
    %2 = arith.cmpi ne, %1, %c0_i32_0 : i32
    scf.if %2 {
      %cst_63 = arith.constant 0.000000e+00 : f32
      %179 = vector.broadcast %cst_63 : f32 to vector<16x128xf32>
      %c0_64 = arith.constant 0 : index
      %c0_65 = arith.constant 0 : index
      %180 = vector.load %arg14[%c0_64, %c0_65] : memref<16x128xf32, #tpu.memory_space<vmem>>, vector<16x128xf32>
      tpu.vector_store %arg14[%c0_64, %c0_65], %179 {strides = array<i32>} : memref<16x128xf32, #tpu.memory_space<vmem>>, vector<16x128xf32>,
    } else {
    }
    %c0 = arith.constant 0 : index
    %c0_1 = arith.constant 0 : index
    %c0_2 = arith.constant 0 : index
    %3 = vector.load %arg2[%c0, %c0_1, %c0_2] : memref<8x16x16xbf16, #tpu.memory_space<vmem>>, vector<8x16x16xbf16>
    %4 = vector.shape_cast %3 : vector<8x16x16xbf16> to vector<128x16xbf16>
    %c0_3 = arith.constant 0 : index
    %c0_4 = arith.constant 0 : index
    %5 = vector.load %arg3[%c0_3, %c0_4] : memref<16x256xbf16, #tpu.memory_space<vmem>>, vector<16x256xbf16>
    %cst = arith.constant dense<0.000000e+00> : vector<128x256xf32>
    %6 = tpu.matmul %4, %5, %cst {dimension_numbers = #tpu.dot_dimension_numbers<[1], [0], [0], [1], [0, 0, 1, 1], [], []>} : vector<128x16xbf16>, vector<16x256xbf16>, vector<128x256xf32> -> vector<128x256xf32>
    %c0_5 = arith.constant 0 : index
    %c0_6 = arith.constant 0 : index
    %7 = vector.load %arg4[%c0_5, %c0_6] : memref<1x256xf32, #tpu.memory_space<vmem>>, vector<1x256xf32>
    %8 = vector.broadcast %7 : vector<1x256xf32> to vector<128x256xf32>
    %9 = arith.addf %6, %8 : vector<128x256xf32>
    %10 = arith.truncf %9 : vector<128x256xf32> to vector<128x256xbf16>
    %c0_7 = arith.constant 0 : index
    %c0_8 = arith.constant 0 : index
    %11 = vector.load %arg15[%c0_7, %c0_8] : memref<128x256xbf16, #tpu.memory_space<vmem>>, vector<128x256xbf16>
    tpu.vector_store %arg15[%c0_7, %c0_8], %10 {strides = array<i32>} : memref<128x256xbf16, #tpu.memory_space<vmem>>, vector<128x256xbf16>,
    %c0_9 = arith.constant 0 : index
    %c0_10 = arith.constant 0 : index
    %12 = vector.load %arg14[%c0_9, %c0_10] : memref<16x128xf32, #tpu.memory_space<vmem>>, vector<16x128xf32>
    %c0_i32_11 = arith.constant 0 : i32
    %c16_i32 = arith.constant 16 : i32
    %13 = arith.muli %c0_i32_11, %c16_i32 : i32
    %14 = tpu.assume_multiple %13, 16 : i32
    %15 = arith.index_cast %14 : i32 to index
    %c0_12 = arith.constant 0 : index
    %16 = vector.load %arg15[%15, %c0_12] : memref<128x256xbf16, #tpu.memory_space<vmem>>, vector<16x256xbf16>
    %17 = arith.extf %16 : vector<16x256xbf16> to vector<16x256xf32>
    %18 = vector.extract_strided_slice %17 {offsets = [0, 0], sizes = [16, 128], strides = [1, 1]} : vector<16x256xf32> to vector<16x128xf32>
    %cst_13 = arith.constant 5.000000e-01 : f32
    %19 = vector.broadcast %cst_13 : f32 to vector<16x128xf32>
    %20 = arith.mulf %19, %18 : vector<16x128xf32>
    %21 = math.tanh %20 : vector<16x128xf32>
    %cst_14 = arith.constant 1.000000e+00 : f32
    %22 = vector.broadcast %cst_14 : f32 to vector<16x128xf32>
    %23 = arith.addf %22, %21 : vector<16x128xf32>
    %cst_15 = arith.constant 5.000000e-01 : f32
    %24 = vector.broadcast %cst_15 : f32 to vector<16x128xf32>
    %25 = arith.mulf %24, %23 : vector<16x128xf32>
    %cst_16 = arith.constant 1.000000e+00 : f32
    %26 = vector.broadcast %cst_16 : f32 to vector<16x128xf32>
    %27 = arith.subf %26, %25 : vector<16x128xf32>
    %28 = vector.extract_strided_slice %17 {offsets = [0, 128], sizes = [16, 128], strides = [1, 1]} : vector<16x256xf32> to vector<16x128xf32>
    %29 = math.tanh %28 : vector<16x128xf32>
    %30 = arith.mulf %27, %29 : vector<16x128xf32>
    %31 = arith.mulf %25, %12 : vector<16x128xf32>
    %32 = arith.addf %31, %30 : vector<16x128xf32>
    %c1_i32 = arith.constant 1 : i32
    %c16_i32_17 = arith.constant 16 : i32
    %33 = arith.muli %c1_i32, %c16_i32_17 : i32
    %34 = tpu.assume_multiple %33, 16 : i32
    %35 = arith.index_cast %34 : i32 to index
    %c0_18 = arith.constant 0 : index
    %36 = vector.load %arg15[%35, %c0_18] : memref<128x256xbf16, #tpu.memory_space<vmem>>, vector<16x256xbf16>
    %37 = arith.extf %36 : vector<16x256xbf16> to vector<16x256xf32>
    %38 = vector.extract_strided_slice %37 {offsets = [0, 0], sizes = [16, 128], strides = [1, 1]} : vector<16x256xf32> to vector<16x128xf32>
    %cst_19 = arith.constant 5.000000e-01 : f32
    %39 = vector.broadcast %cst_19 : f32 to vector<16x128xf32>
    %40 = arith.mulf %39, %38 : vector<16x128xf32>
    %41 = math.tanh %40 : vector<16x128xf32>
    %cst_20 = arith.constant 1.000000e+00 : f32
    %42 = vector.broadcast %cst_20 : f32 to vector<16x128xf32>
    %43 = arith.addf %42, %41 : vector<16x128xf32>
    %cst_21 = arith.constant 5.000000e-01 : f32
    %44 = vector.broadcast %cst_21 : f32 to vector<16x128xf32>
    %45 = arith.mulf %44, %43 : vector<16x128xf32>
    %cst_22 = arith.constant 1.000000e+00 : f32
    %46 = vector.broadcast %cst_22 : f32 to vector<16x128xf32>
    %47 = arith.subf %46, %45 : vector<16x128xf32>
    %48 = vector.extract_strided_slice %37 {offsets = [0, 128], sizes = [16, 128], strides = [1, 1]} : vector<16x256xf32> to vector<16x128xf32>
    %49 = math.tanh %48 : vector<16x128xf32>
    %50 = arith.mulf %47, %49 : vector<16x128xf32>
    %51 = arith.mulf %45, %32 : vector<16x128xf32>
    %52 = arith.addf %51, %50 : vector<16x128xf32>
    %c2_i32 = arith.constant 2 : i32
    %c16_i32_23 = arith.constant 16 : i32
    %53 = arith.muli %c2_i32, %c16_i32_23 : i32
    %54 = tpu.assume_multiple %53, 16 : i32
    %55 = arith.index_cast %54 : i32 to index
    %c0_24 = arith.constant 0 : index
    %56 = vector.load %arg15[%55, %c0_24] : memref<128x256xbf16, #tpu.memory_space<vmem>>, vector<16x256xbf16>
    %57 = arith.extf %56 : vector<16x256xbf16> to vector<16x256xf32>
    %58 = vector.extract_strided_slice %57 {offsets = [0, 0], sizes = [16, 128], strides = [1, 1]} : vector<16x256xf32> to vector<16x128xf32>
    %cst_25 = arith.constant 5.000000e-01 : f32
    %59 = vector.broadcast %cst_25 : f32 to vector<16x128xf32>
    %60 = arith.mulf %59, %58 : vector<16x128xf32>
    %61 = math.tanh %60 : vector<16x128xf32>
    %cst_26 = arith.constant 1.000000e+00 : f32
    %62 = vector.broadcast %cst_26 : f32 to vector<16x128xf32>
    %63 = arith.addf %62, %61 : vector<16x128xf32>
    %cst_27 = arith.constant 5.000000e-01 : f32
    %64 = vector.broadcast %cst_27 : f32 to vector<16x128xf32>
    %65 = arith.mulf %64, %63 : vector<16x128xf32>
    %cst_28 = arith.constant 1.000000e+00 : f32
    %66 = vector.broadcast %cst_28 : f32 to vector<16x128xf32>
    %67 = arith.subf %66, %65 : vector<16x128xf32>
    %68 = vector.extract_strided_slice %57 {offsets = [0, 128], sizes = [16, 128], strides = [1, 1]} : vector<16x256xf32> to vector<16x128xf32>
    %69 = math.tanh %68 : vector<16x128xf32>
    %70 = arith.mulf %67, %69 : vector<16x128xf32>
    %71 = arith.mulf %65, %52 : vector<16x128xf32>
    %72 = arith.addf %71, %70 : vector<16x128xf32>
    %c3_i32 = arith.constant 3 : i32
    %c16_i32_29 = arith.constant 16 : i32
    %73 = arith.muli %c3_i32, %c16_i32_29 : i32
    %74 = tpu.assume_multiple %73, 16 : i32
    %75 = arith.index_cast %74 : i32 to index
    %c0_30 = arith.constant 0 : index
    %76 = vector.load %arg15[%75, %c0_30] : memref<128x256xbf16, #tpu.memory_space<vmem>>, vector<16x256xbf16>
    %77 = arith.extf %76 : vector<16x256xbf16> to vector<16x256xf32>
    %78 = vector.extract_strided_slice %77 {offsets = [0, 0], sizes = [16, 128], strides = [1, 1]} : vector<16x256xf32> to vector<16x128xf32>
    %cst_31 = arith.constant 5.000000e-01 : f32
    %79 = vector.broadcast %cst_31 : f32 to vector<16x128xf32>
    %80 = arith.mulf %79, %78 : vector<16x128xf32>
    %81 = math.tanh %80 : vector<16x128xf32>
    %cst_32 = arith.constant 1.000000e+00 : f32
    %82 = vector.broadcast %cst_32 : f32 to vector<16x128xf32>
    %83 = arith.addf %82, %81 : vector<16x128xf32>
    %cst_33 = arith.constant 5.000000e-01 : f32
    %84 = vector.broadcast %cst_33 : f32 to vector<16x128xf32>
    %85 = arith.mulf %84, %83 : vector<16x128xf32>
    %cst_34 = arith.constant 1.000000e+00 : f32
    %86 = vector.broadcast %cst_34 : f32 to vector<16x128xf32>
    %87 = arith.subf %86, %85 : vector<16x128xf32>
    %88 = vector.extract_strided_slice %77 {offsets = [0, 128], sizes = [16, 128], strides = [1, 1]} : vector<16x256xf32> to vector<16x128xf32>
    %89 = math.tanh %88 : vector<16x128xf32>
    %90 = arith.mulf %87, %89 : vector<16x128xf32>
    %91 = arith.mulf %85, %72 : vector<16x128xf32>
    %92 = arith.addf %91, %90 : vector<16x128xf32>
    %c4_i32 = arith.constant 4 : i32
    %c16_i32_35 = arith.constant 16 : i32
    %93 = arith.muli %c4_i32, %c16_i32_35 : i32
    %94 = tpu.assume_multiple %93, 16 : i32
    %95 = arith.index_cast %94 : i32 to index
    %c0_36 = arith.constant 0 : index
    %96 = vector.load %arg15[%95, %c0_36] : memref<128x256xbf16, #tpu.memory_space<vmem>>, vector<16x256xbf16>
    %97 = arith.extf %96 : vector<16x256xbf16> to vector<16x256xf32>
    %98 = vector.extract_strided_slice %97 {offsets = [0, 0], sizes = [16, 128], strides = [1, 1]} : vector<16x256xf32> to vector<16x128xf32>
    %cst_37 = arith.constant 5.000000e-01 : f32
    %99 = vector.broadcast %cst_37 : f32 to vector<16x128xf32>
    %100 = arith.mulf %99, %98 : vector<16x128xf32>
    %101 = math.tanh %100 : vector<16x128xf32>
    %cst_38 = arith.constant 1.000000e+00 : f32
    %102 = vector.broadcast %cst_38 : f32 to vector<16x128xf32>
    %103 = arith.addf %102, %101 : vector<16x128xf32>
    %cst_39 = arith.constant 5.000000e-01 : f32
    %104 = vector.broadcast %cst_39 : f32 to vector<16x128xf32>
    %105 = arith.mulf %104, %103 : vector<16x128xf32>
    %cst_40 = arith.constant 1.000000e+00 : f32
    %106 = vector.broadcast %cst_40 : f32 to vector<16x128xf32>
    %107 = arith.subf %106, %105 : vector<16x128xf32>
    %108 = vector.extract_strided_slice %97 {offsets = [0, 128], sizes = [16, 128], strides = [1, 1]} : vector<16x256xf32> to vector<16x128xf32>
    %109 = math.tanh %108 : vector<16x128xf32>
    %110 = arith.mulf %107, %109 : vector<16x128xf32>
    %111 = arith.mulf %105, %92 : vector<16x128xf32>
    %112 = arith.addf %111, %110 : vector<16x128xf32>
    %c5_i32 = arith.constant 5 : i32
    %c16_i32_41 = arith.constant 16 : i32
    %113 = arith.muli %c5_i32, %c16_i32_41 : i32
    %114 = tpu.assume_multiple %113, 16 : i32
    %115 = arith.index_cast %114 : i32 to index
    %c0_42 = arith.constant 0 : index
    %116 = vector.load %arg15[%115, %c0_42] : memref<128x256xbf16, #tpu.memory_space<vmem>>, vector<16x256xbf16>
    %117 = arith.extf %116 : vector<16x256xbf16> to vector<16x256xf32>
    %118 = vector.extract_strided_slice %117 {offsets = [0, 0], sizes = [16, 128], strides = [1, 1]} : vector<16x256xf32> to vector<16x128xf32>
    %cst_43 = arith.constant 5.000000e-01 : f32
    %119 = vector.broadcast %cst_43 : f32 to vector<16x128xf32>
    %120 = arith.mulf %119, %118 : vector<16x128xf32>
    %121 = math.tanh %120 : vector<16x128xf32>
    %cst_44 = arith.constant 1.000000e+00 : f32
    %122 = vector.broadcast %cst_44 : f32 to vector<16x128xf32>
    %123 = arith.addf %122, %121 : vector<16x128xf32>
    %cst_45 = arith.constant 5.000000e-01 : f32
    %124 = vector.broadcast %cst_45 : f32 to vector<16x128xf32>
    %125 = arith.mulf %124, %123 : vector<16x128xf32>
    %cst_46 = arith.constant 1.000000e+00 : f32
    %126 = vector.broadcast %cst_46 : f32 to vector<16x128xf32>
    %127 = arith.subf %126, %125 : vector<16x128xf32>
    %128 = vector.extract_strided_slice %117 {offsets = [0, 128], sizes = [16, 128], strides = [1, 1]} : vector<16x256xf32> to vector<16x128xf32>
    %129 = math.tanh %128 : vector<16x128xf32>
    %130 = arith.mulf %127, %129 : vector<16x128xf32>
    %131 = arith.mulf %125, %112 : vector<16x128xf32>
    %132 = arith.addf %131, %130 : vector<16x128xf32>
    %c6_i32 = arith.constant 6 : i32
    %c16_i32_47 = arith.constant 16 : i32
    %133 = arith.muli %c6_i32, %c16_i32_47 : i32
    %134 = tpu.assume_multiple %133, 16 : i32
    %135 = arith.index_cast %134 : i32 to index
    %c0_48 = arith.constant 0 : index
    %136 = vector.load %arg15[%135, %c0_48] : memref<128x256xbf16, #tpu.memory_space<vmem>>, vector<16x256xbf16>
    %137 = arith.extf %136 : vector<16x256xbf16> to vector<16x256xf32>
    %138 = vector.extract_strided_slice %137 {offsets = [0, 0], sizes = [16, 128], strides = [1, 1]} : vector<16x256xf32> to vector<16x128xf32>
    %cst_49 = arith.constant 5.000000e-01 : f32
    %139 = vector.broadcast %cst_49 : f32 to vector<16x128xf32>
    %140 = arith.mulf %139, %138 : vector<16x128xf32>
    %141 = math.tanh %140 : vector<16x128xf32>
    %cst_50 = arith.constant 1.000000e+00 : f32
    %142 = vector.broadcast %cst_50 : f32 to vector<16x128xf32>
    %143 = arith.addf %142, %141 : vector<16x128xf32>
    %cst_51 = arith.constant 5.000000e-01 : f32
    %144 = vector.broadcast %cst_51 : f32 to vector<16x128xf32>
    %145 = arith.mulf %144, %143 : vector<16x128xf32>
    %cst_52 = arith.constant 1.000000e+00 : f32
    %146 = vector.broadcast %cst_52 : f32 to vector<16x128xf32>
    %147 = arith.subf %146, %145 : vector<16x128xf32>
    %148 = vector.extract_strided_slice %137 {offsets = [0, 128], sizes = [16, 128], strides = [1, 1]} : vector<16x256xf32> to vector<16x128xf32>
    %149 = math.tanh %148 : vector<16x128xf32>
    %150 = arith.mulf %147, %149 : vector<16x128xf32>
    %151 = arith.mulf %145, %132 : vector<16x128xf32>
    %152 = arith.addf %151, %150 : vector<16x128xf32>
    %c7_i32 = arith.constant 7 : i32
    %c16_i32_53 = arith.constant 16 : i32
    %153 = arith.muli %c7_i32, %c16_i32_53 : i32
    %154 = tpu.assume_multiple %153, 16 : i32
    %155 = arith.index_cast %154 : i32 to index
    %c0_54 = arith.constant 0 : index
    %156 = vector.load %arg15[%155, %c0_54] : memref<128x256xbf16, #tpu.memory_space<vmem>>, vector<16x256xbf16>
    %157 = arith.extf %156 : vector<16x256xbf16> to vector<16x256xf32>
    %158 = vector.extract_strided_slice %157 {offsets = [0, 0], sizes = [16, 128], strides = [1, 1]} : vector<16x256xf32> to vector<16x128xf32>
    %cst_55 = arith.constant 5.000000e-01 : f32
    %159 = vector.broadcast %cst_55 : f32 to vector<16x128xf32>
    %160 = arith.mulf %159, %158 : vector<16x128xf32>
    %161 = math.tanh %160 : vector<16x128xf32>
    %cst_56 = arith.constant 1.000000e+00 : f32
    %162 = vector.broadcast %cst_56 : f32 to vector<16x128xf32>
    %163 = arith.addf %162, %161 : vector<16x128xf32>
    %cst_57 = arith.constant 5.000000e-01 : f32
    %164 = vector.broadcast %cst_57 : f32 to vector<16x128xf32>
    %165 = arith.mulf %164, %163 : vector<16x128xf32>
    %cst_58 = arith.constant 1.000000e+00 : f32
    %166 = vector.broadcast %cst_58 : f32 to vector<16x128xf32>
    %167 = arith.subf %166, %165 : vector<16x128xf32>
    %168 = vector.extract_strided_slice %157 {offsets = [0, 128], sizes = [16, 128], strides = [1, 1]} : vector<16x256xf32> to vector<16x128xf32>
    %169 = math.tanh %168 : vector<16x128xf32>
    %170 = arith.mulf %167, %169 : vector<16x128xf32>
    %171 = arith.mulf %165, %152 : vector<16x128xf32>
    %172 = arith.addf %171, %170 : vector<16x128xf32>
    %c8_i32 = arith.constant 8 : i32
    %c0_i32_59 = arith.constant 0 : i32
    %173 = arith.cmpi ne, %arg1, %c0_i32_59 : i32
    %174 = arith.extui %173 : i1 to i32
    %c0_i32_60 = arith.constant 0 : i32
    %175 = arith.cmpi ne, %174, %c0_i32_60 : i32
    scf.if %175 {
      %c0_63 = arith.constant 0 : index
      %c0_64 = arith.constant 0 : index
      %179 = vector.load %arg14[%c0_63, %c0_64] : memref<16x128xf32, #tpu.memory_space<vmem>>, vector<16x128xf32>
      tpu.vector_store %arg14[%c0_63, %c0_64], %172 {strides = array<i32>} : memref<16x128xf32, #tpu.memory_space<vmem>>, vector<16x128xf32>,
    } else {
    }
    %c0_i32_61 = arith.constant 0 : i32
    %176 = arith.cmpi eq, %arg1, %c0_i32_61 : i32
    %177 = arith.extui %176 : i1 to i32
    %c0_i32_62 = arith.constant 0 : i32
    %178 = arith.cmpi ne, %177, %c0_i32_62 : i32
    scf.if %178 {
      %c7 = arith.constant 7 : index
      %c0_63 = arith.constant 0 : index
      %c0_64 = arith.constant 0 : index
      %179 = vector.load %arg2[%c7, %c0_63, %c0_64] : memref<8x16x16xbf16, #tpu.memory_space<vmem>>, vector<1x16x16xbf16>
      %180 = vector.shape_cast %179 : vector<1x16x16xbf16> to vector<16x16xbf16>
      %c0_65 = arith.constant 0 : index
      %c0_66 = arith.constant 0 : index
      %181 = vector.load %arg5[%c0_65, %c0_66] : memref<16x128xbf16, #tpu.memory_space<vmem>>, vector<16x128xbf16>
      %cst_67 = arith.constant dense<0.000000e+00> : vector<16x128xf32>
      %182 = tpu.matmul %180, %181, %cst_67 {dimension_numbers = #tpu.dot_dimension_numbers<[1], [0], [0], [1], [0, 0, 1, 1], [], []>} : vector<16x16xbf16>, vector<16x128xbf16>, vector<16x128xf32> -> vector<16x128xf32>
      %c0_68 = arith.constant 0 : index
      %c0_69 = arith.constant 0 : index
      %183 = vector.load %arg6[%c0_68, %c0_69] : memref<1x128xf32, #tpu.memory_space<vmem>>, vector<1x128xf32>
      %184 = vector.broadcast %183 : vector<1x128xf32> to vector<16x128xf32>
      %185 = arith.addf %182, %184 : vector<16x128xf32>
      %cst_70 = arith.constant 5.000000e-01 : f32
      %186 = vector.broadcast %cst_70 : f32 to vector<16x128xf32>
      %187 = arith.mulf %186, %185 : vector<16x128xf32>
      %188 = math.tanh %187 : vector<16x128xf32>
      %cst_71 = arith.constant 1.000000e+00 : f32
      %189 = vector.broadcast %cst_71 : f32 to vector<16x128xf32>
      %190 = arith.addf %189, %188 : vector<16x128xf32>
      %cst_72 = arith.constant 5.000000e-01 : f32
      %191 = vector.broadcast %cst_72 : f32 to vector<16x128xf32>
      %192 = arith.mulf %191, %190 : vector<16x128xf32>
      %193 = arith.mulf %172, %192 : vector<16x128xf32>
      %194 = arith.truncf %193 : vector<16x128xf32> to vector<16x128xbf16>
      %c0_73 = arith.constant 0 : index
      %c0_74 = arith.constant 0 : index
      %195 = vector.load %arg7[%c0_73, %c0_74] : memref<128x128xbf16, #tpu.memory_space<vmem>>, vector<128x128xbf16>
      %cst_75 = arith.constant dense<0.000000e+00> : vector<16x128xf32>
      %196 = tpu.matmul %194, %195, %cst_75 {dimension_numbers = #tpu.dot_dimension_numbers<[1], [0], [0], [1], [0, 0, 1, 1], [], []>} : vector<16x128xbf16>, vector<128x128xbf16>, vector<16x128xf32> -> vector<16x128xf32>
      %c0_76 = arith.constant 0 : index
      %c0_77 = arith.constant 0 : index
      %197 = vector.load %arg8[%c0_76, %c0_77] : memref<1x128xf32, #tpu.memory_space<vmem>>, vector<1x128xf32>
      %198 = vector.broadcast %197 : vector<1x128xf32> to vector<16x128xf32>
      %199 = arith.addf %196, %198 : vector<16x128xf32>
      %cst_78 = arith.constant 0.000000e+00 : f32
      %200 = vector.broadcast %cst_78 : f32 to vector<16x128xf32>
      %201 = arith.maximumf %199, %200 : vector<16x128xf32>
      %202 = arith.truncf %201 : vector<16x128xf32> to vector<16x128xbf16>
      %c0_79 = arith.constant 0 : index
      %c0_80 = arith.constant 0 : index
      %203 = vector.load %arg9[%c0_79, %c0_80] : memref<128x128xbf16, #tpu.memory_space<vmem>>, vector<128x128xbf16>
      %cst_81 = arith.constant dense<0.000000e+00> : vector<16x128xf32>
      %204 = tpu.matmul %202, %203, %cst_81 {dimension_numbers = #tpu.dot_dimension_numbers<[1], [0], [0], [1], [0, 0, 1, 1], [], []>} : vector<16x128xbf16>, vector<128x128xbf16>, vector<16x128xf32> -> vector<16x128xf32>
      %c0_82 = arith.constant 0 : index
      %c0_83 = arith.constant 0 : index
      %205 = vector.load %arg10[%c0_82, %c0_83] : memref<1x128xf32, #tpu.memory_space<vmem>>, vector<1x128xf32>
      %206 = vector.broadcast %205 : vector<1x128xf32> to vector<16x128xf32>
      %207 = arith.addf %204, %206 : vector<16x128xf32>
      %cst_84 = arith.constant 0.000000e+00 : f32
      %208 = vector.broadcast %cst_84 : f32 to vector<16x128xf32>
      %209 = arith.maximumf %207, %208 : vector<16x128xf32>
      %210 = arith.truncf %209 : vector<16x128xf32> to vector<16x128xbf16>
      %c0_85 = arith.constant 0 : index
      %c0_86 = arith.constant 0 : index
      %211 = vector.load %arg11[%c0_85, %c0_86] : memref<128x128xbf16, #tpu.memory_space<vmem>>, vector<128x128xbf16>
      %cst_87 = arith.constant dense<0.000000e+00> : vector<16x128xf32>
      %212 = tpu.matmul %210, %211, %cst_87 {dimension_numbers = #tpu.dot_dimension_numbers<[1], [0], [0], [1], [0, 0, 1, 1], [], []>} : vector<16x128xbf16>, vector<128x128xbf16>, vector<16x128xf32> -> vector<16x128xf32>
      %c0_88 = arith.constant 0 : index
      %c0_89 = arith.constant 0 : index
      %213 = vector.load %arg12[%c0_88, %c0_89] : memref<1x128xf32, #tpu.memory_space<vmem>>, vector<1x128xf32>
      %214 = vector.broadcast %213 : vector<1x128xf32> to vector<16x128xf32>
      %215 = arith.addf %212, %214 : vector<16x128xf32>
      %c0_90 = arith.constant 0 : index
      %c0_91 = arith.constant 0 : index
      %216 = vector.load %arg13[%c0_90, %c0_91] : memref<16x128xf32, #tpu.memory_space<vmem>>, vector<16x128xf32>
      tpu.vector_store %arg13[%c0_90, %c0_91], %215 {strides = array<i32>} : memref<16x128xf32, #tpu.memory_space<vmem>>, vector<16x128xf32>,
    } else {
    }
    return
  }
  func.func @transform_0(%arg0: i32, %arg1: i32) -> (i32, i32, i32) {
    %c0_i32 = arith.constant 0 : i32
    %c0_i32_0 = arith.constant 0 : i32
    return %arg1, %arg0, %c0_i32 : i32, i32, i32
  }
  func.func @transform_1(%arg0: i32, %arg1: i32) -> (i32, i32) {
    %c0_i32 = arith.constant 0 : i32
    %c0_i32_0 = arith.constant 0 : i32
    %c0_i32_1 = arith.constant 0 : i32
    return %c0_i32, %c0_i32_0 : i32, i32
  }
  func.func @transform_2(%arg0: i32, %arg1: i32) -> (i32, i32) {
    %c0_i32 = arith.constant 0 : i32
    %c0_i32_0 = arith.constant 0 : i32
    %c0_i32_1 = arith.constant 0 : i32
    return %c0_i32, %c0_i32_0 : i32, i32
  }
  func.func @transform_3(%arg0: i32, %arg1: i32) -> (i32, i32) {
    %c0_i32 = arith.constant 0 : i32
    %c0_i32_0 = arith.constant 0 : i32
    %c0_i32_1 = arith.constant 0 : i32
    return %c0_i32, %c0_i32_0 : i32, i32
  }
  func.func @transform_4(%arg0: i32, %arg1: i32) -> (i32, i32) {
    %c0_i32 = arith.constant 0 : i32
    %c0_i32_0 = arith.constant 0 : i32
    %c0_i32_1 = arith.constant 0 : i32
    return %c0_i32, %c0_i32_0 : i32, i32
  }
  func.func @transform_5(%arg0: i32, %arg1: i32) -> (i32, i32) {
    %c0_i32 = arith.constant 0 : i32
    %c0_i32_0 = arith.constant 0 : i32
    %c0_i32_1 = arith.constant 0 : i32
    return %c0_i32, %c0_i32_0 : i32, i32
  }
  func.func @transform_6(%arg0: i32, %arg1: i32) -> (i32, i32) {
    %c0_i32 = arith.constant 0 : i32
    %c0_i32_0 = arith.constant 0 : i32
    %c0_i32_1 = arith.constant 0 : i32
    return %c0_i32, %c0_i32_0 : i32, i32
  }
  func.func @transform_7(%arg0: i32, %arg1: i32) -> (i32, i32) {
    %c0_i32 = arith.constant 0 : i32
    %c0_i32_0 = arith.constant 0 : i32
    %c0_i32_1 = arith.constant 0 : i32
    return %c0_i32, %c0_i32_0 : i32, i32
  }
  func.func @transform_8(%arg0: i32, %arg1: i32) -> (i32, i32) {
    %c0_i32 = arith.constant 0 : i32
    %c0_i32_0 = arith.constant 0 : i32
    %c0_i32_1 = arith.constant 0 : i32
    return %c0_i32, %c0_i32_0 : i32, i32
  }
  func.func @transform_9(%arg0: i32, %arg1: i32) -> (i32, i32) {
    %c0_i32 = arith.constant 0 : i32
    %c0_i32_0 = arith.constant 0 : i32
    %c0_i32_1 = arith.constant 0 : i32
    return %c0_i32, %c0_i32_0 : i32, i32
  }
  func.func @transform_10(%arg0: i32, %arg1: i32) -> (i32, i32) {
    %c0_i32 = arith.constant 0 : i32
    %c0_i32_0 = arith.constant 0 : i32
    %c0_i32_1 = arith.constant 0 : i32
    return %c0_i32, %c0_i32_0 : i32, i32
  }
  func.func @transform_11(%arg0: i32, %arg1: i32) -> (i32, i32) {
    %c0_i32 = arith.constant 0 : i32
    %c0_i32_0 = arith.constant 0 : i32
    return %arg0, %c0_i32 : i32, i32
  }
}

</mosaic_0001>

<bundles_post_ra>
// kernel: tpu_custom_call.1
= control target key start
LH: loop header
LB: loop body
LE: loop exit
PB: predicated region body
PF: predicated region fallthrough
CT: control target
= control target key end

     0   :  { %16 = vsyncpa [#allocation5], 0  ;;  %s1667_s0 = inlined_call_operand.hbm [shape: bf16[8,16,16], index: 0, kind: input, shape index: {}]   ;;  %s1668_s1 = inlined_call_operand.hbm [shape: bf16[16,256], index: 1, kind: input, shape index: {}]   ;;  %s1669_s2 = inlined_call_operand.hbm [shape: f32[1,256], index: 2, kind: input, shape index: {}]   ;;  %s1670_s3 = inlined_call_operand.hbm [shape: bf16[16,128], index: 3, kind: input, shape index: {}]   ;;  %s1671_s4 = inlined_call_operand.vmem [shape: f32[1,128], index: 4, kind: input, shape index: {}]   ;;  %s1672_s5 = inlined_call_operand.hbm [shape: bf16[128,128], index: 5, kind: input, shape index: {}]   ;;  %s1673_s6 = inlined_call_operand.vmem [shape: f32[1,128], index: 6, kind: input, shape index: {}]   ;;  %s1674_s7 = inlined_call_operand.hbm [shape: bf16[128,128], index: 7, kind: input, shape index: {}]   ;;  %s1675_s8 = inlined_call_operand.vmem [shape: f32[1,128], index: 8, kind: input, shape index: {}]   ;;  %s1676_s9 = inlined_call_operand.hbm [shape: bf16[128,128], index: 9, kind: input, shape index: {}]   ;;  %s1677_s10 = inlined_call_operand.vmem [shape: f32[1,128], index: 10, kind: input, shape index: {}]   ;;  %s1678_s11 = inlined_call_operand.hbm [shape: f32[16,128], index: 11, kind: output, shape index: {}]  }
   0x1   :  { %17 = vsyncpa [#allocation8], 0 }
   0x2   :  { %18 = vsyncpa [#allocation11], 0 }
   0x3   :  { %19 = vsyncpa [#allocation14], 0  ;;  %s38_s19 = sshll.u32 %s1668_s1, 4  ;;  %s39_s19 = int_to_ptr.hbm [resolvable:$true] %s38_s19 }
   0x4   :  { %20 = vsyncpa [#allocation6], 0  ;;  %s1425_s20 = smov [#allocation7]   ;;  %s1426_s22 = smov 128  }
   0x5   :  { %s40_s21 = sshll.u32 %s1425_s20, 4  ;;  %s1427_s23 = smov 8   ;;  %s41_s21 = int_to_ptr.vmem [resolvable:$true] %s40_s21 }
   0x6   :  { %46 = dma.hbm_to_vmem [thread:$0]  %s39_s19, 256, %s41_s21, [#allocation8], %s1426_s22, %s1426_s22, %s1427_s23  }
   0x7   :  { %s62_s26 = sshll.u32 %s1670_s3, 4  ;;  %s1428_s27 = smov [#allocation10]   ;;  %s63_s26 = int_to_ptr.hbm [resolvable:$true] %s62_s26 }
   0x8   :  { %s64_s28 = sshll.u32 %s1428_s27, 4  ;;  %s92_s30 = sshll.u32 %s1674_s7, 4  ;;  %s65_s28 = int_to_ptr.vmem [resolvable:$true] %s64_s28  ;;  %s93_s30 = int_to_ptr.hbm [resolvable:$true] %s92_s30 }
   0x9   :  { %s1429_s12 = smov 64   ;;  %s1430_s13 = smov 4  }
   0xa   :  { %70 = dma.hbm_to_vmem [thread:$0]  %s63_s26, 128, %s65_s28, [#allocation11], %s1429_s12, %s1429_s12, %s1430_s13  }
   0xb   :  { %s25_s16 = sshll.u32 %s1667_s0, 4  ;;  %s1431_s3 = smov [#allocation13]   ;;  %s26_s16 = int_to_ptr.hbm [resolvable:$true] %s25_s16 }
   0xc   :  { %s94_s17 = sshll.u32 %s1431_s3, 4  ;;  %s1432_s7 = smov [#allocation4]   ;;  %s95_s17 = int_to_ptr.vmem [resolvable:$true] %s94_s17 }
   0xd   :  { %100 = dma.hbm_to_vmem [thread:$0]  %s93_s30, 1024, %s95_s17, [#allocation14], %s1429_s12, %s1429_s12, %s1430_s13  }
   0xe   :  { %s27_s18 = sshll.u32 %s1432_s7, 4  ;;  %s52_s21 = sshll.u32 %s1669_s2, 4  ;;  %s28_s18 = int_to_ptr.vmem [resolvable:$true] %s27_s18  ;;  %s53_s21 = int_to_ptr.hbm [resolvable:$true] %s52_s21 }
   0xf   :  { %33 = dma.hbm_to_vmem [thread:$0]  %s26_s16, 1024, %s28_s18, [#allocation5], %s1429_s12, %s1429_s12, %s1430_s13  }
  0x10   :  { %s77_s25 = sshll.u32 %s1672_s5, 4  ;;  %s1433_s26 = smov [#allocation9]   ;;  %s78_s25 = int_to_ptr.hbm [resolvable:$true] %s77_s25 }
  0x11   :  { %s54_s27 = sshll.u32 %s1433_s26, 4  ;;  %s1434_s28 = smov [#allocation12]   ;;  %s55_s27 = int_to_ptr.vmem [resolvable:$true] %s54_s27 }
  0x12   :  { %57 = dma.hbm_to_vmem [thread:$0]  %s53_s21, 32, %s55_s27, [#allocation8]  }
  0x13   :  { %s79_s29 = sshll.u32 %s1434_s28, 4  ;;  %s107_s2 = sshll.u32 %s1676_s9, 4  ;;  %s80_s29 = int_to_ptr.vmem [resolvable:$true] %s79_s29  ;;  %s108_s2 = int_to_ptr.hbm [resolvable:$true] %s107_s2 }
  0x14   :  { %85 = dma.hbm_to_vmem [thread:$0]  %s78_s25, 1024, %s80_s29, [#allocation11], %s1429_s12, %s1429_s12, %s1430_s13  }
  0x15   :  { %s1435_s14 = smov [#allocation15]  }
  0x16   :  { %s109_s15 = sshll.u32 %s1435_s14, 4  ;;  %s110_s15 = int_to_ptr.vmem [resolvable:$true] %s109_s15 }
  0x17   :  { %115 = dma.hbm_to_vmem [thread:$0]  %s108_s2, 1024, %s110_s15, [#allocation14], %s1429_s12, %s1429_s12, %s1430_s13  }
  0x18   :  { %1415 = dma.done.wait [#allocation5], 1024  }
  0x19   :  { %1416 = vsyncadd [#allocation5], 4294966272 }
  0x1a   :  { %1417 = dma.done.wait [#allocation8], 288  }
  0x1b   :  { %1418 = vsyncadd [#allocation8], 4294967008 }
  0x1c   :  { %1419 = dma.done.wait [#allocation11], 1152  }
  0x1d   :  { %1420 = vsyncadd [#allocation11], 4294966144 }
  0x1e   :  { %1421 = dma.done.wait [#allocation14], 2048  }
  0x1f   :  { %1422 = vsyncadd [#allocation14], 4294965248  ;;  %v974_v0 = vld [vmem:[#allocation7] sm:$0xf]  ;;  %v1110_v1 = vld [vmem:[#allocation7 + $0x4] sm:$0xf0] }
  0x20   :  { %v1109_v2 = vld [vmem:[#allocation7 + $0x4] sm:$0xf]  ;;  %v975_v3 = vor.u32 %v1110_v1, %v974_v0  ;;  %v976_v4 = vld [vmem:[#allocation7 + $0x8] sm:$0xf0]  ;;  %vm227_vm0 = vcmask 130048   ;;  %v1107_v7 = vld [vmem:[#allocation4 + $0x30] sm:$0xff] }
  0x21   :  { %v979_v5 = vor.u32 %v1109_v2, %v976_v4  ;;  %v1101_v6 = vld [vmem:[#allocation4] sm:$0xff]  ;;  %v1102_v8 = vld [vmem:[#allocation4 + $0x8] sm:$0xff]  ;;  %v1108_v9 = vld [vmem:[#allocation4 + $0x38] sm:$0xff]  ;;  %s1436_s17 = smov [#allocation16]  }
  0x22   :  { %259 = vmatpush.bf16.msra.mxu0 %v975_v3  ;;  %1137 = vmatpush.bf16.msra.mxu2 %v975_v3  ;;  %v1112_v10 = vld [vmem:[#allocation10] sm:$0xff]  ;;  %v1105_v14 = vld [vmem:[#allocation4 + $0x20] sm:$0xff]  ;;  %v1106_v15 = vld [vmem:[#allocation4 + $0x28] sm:$0xff]  ;;  %s915_s7 = sshll.u32 %s1436_s17, 4  ;;  %s916_s7 = int_to_ptr.vmem [resolvable:$true] %s915_s7 }
  0x23   :  { %308 = vmatpush.bf16.msra.mxu1 %v979_v5  ;;  %1138 = vmatpush.bf16.msra.mxu3 %v979_v5  ;;  %v1103_v11 = vld [vmem:[#allocation4 + $0x10] sm:$0xff]  ;;  %v1104_v12 = vld [vmem:[#allocation4 + $0x18] sm:$0xff] }
  0x24   :  { %v1111_v13 = vld [vmem:[#allocation4 + $0x38] sm:$0xff]  ;;  %v171_v16 = vld [vmem:[#allocation9] sm:$0x3] }
  0x25   :  { %980 = vmatmul.msk.bf16.vlgmr.msra.gmra.mxu0 %vm227_vm0, %v1101_v6  ;;  %986 = vmatmul.msk.bf16.vlgmr.msra.gmra.mxu2 %vm227_vm0, %v1107_v7  ;;  %v1553_v17 = vperm.slane %v171_v16, 0  ;;  %v1555_v18 = vperm.slane %v171_v16, 1 }
  0x26   :  { %988 = vmatmul.msk.bf16.vlgmr.msra.gmra.mxu1 %vm227_vm0, %v1101_v6  ;;  %994 = vmatmul.msk.bf16.vlgmr.msra.gmra.mxu3 %vm227_vm0, %v1107_v7 }
  0x27   :  { %639 = vmatpush.bf16.msrb.mxu2 %v1112_v10 }
  0x35   :  { %981 = vmatmul.msk.bf16.gmra.mxu0 %vm227_vm0, %v1102_v8  ;;  %987 = vmatmul.msk.bf16.gmra.mxu2 %vm227_vm0, %v1108_v9 }
  0x36   :  { %989 = vmatmul.msk.bf16.gmra.mxu1 %vm227_vm0, %v1102_v8  ;;  %995 = vmatmul.msk.bf16.gmra.mxu3 %vm227_vm0, %v1108_v9  ;;  %v1120_v9 = vld [vmem:[#allocation12 + $0x38] sm:$0xff] }
  0x37   :  { %725 = vmatpush.bf16.msrb.mxu3 %v1120_v9 }
  0x45   :  { %982 = vmatmul.msk.bf16.gmra.mxu0 %vm227_vm0, %v1103_v11  ;;  %1004 = vmatmul.msk.bf16.vlgmr.msrb.gmra.mxu2 %vm227_vm0, %v1111_v13 }
  0x46   :  { %990 = vmatmul.msk.bf16.gmra.mxu1 %vm227_vm0, %v1103_v11 }
  0x55   :  { %983 = vmatmul.msk.bf16.gmra.mxu0 %vm227_vm0, %v1104_v12 }
  0x56   :  { %991 = vmatmul.msk.bf16.gmra.mxu1 %vm227_vm0, %v1104_v12 }
  0x65   :  { %984 = vmatmul.msk.bf16.gmra.mxu0 %vm227_vm0, %v1105_v14 }
  0x66   :  { %992 = vmatmul.msk.bf16.gmra.mxu1 %vm227_vm0, %v1105_v14 }
  0x75   :  { %985 = vmatmul.msk.bf16.gmra.mxu0 %vm227_vm0, %v1106_v15 }
  0x76   :  { %993 = vmatmul.msk.bf16.gmra.mxu1 %vm227_vm0, %v1106_v15 }
  0xa2   :  { %v261_v19 = vpop.f32.mrf.mxu0 }
  0xa3   :  { %v262_v20 = vadd.f32 %v261_v19, %v1553_v17  ;;  %v310_v21 = vpop.f32.mrf.mxu1 }
  0xa4   :  { %v311_v22 = vadd.f32 %v310_v21, %v1555_v18 }
  0xa6   :  { %v350_v23 = vpack.c.bf16 %v311_v22, %v262_v20 }
  0xa8   :  { %v389_v36 = vunpack.c.l.bf16 %v350_v23  ;;  %v291_v40 = vpop.f32.mrf.mxu2  ;;  %v390_v4 = vunpack.c.h.bf16 %v350_v23 }
  0xa9   :  { %v340_v42 = vpop.f32.mrf.mxu3  ;;  %v292_v19 = vadd.f32 %v291_v40, %v1553_v17 }
  0xaa   :  { %v263_v24 = vpop.f32.mrf.mxu0  ;;  %v393_v41 = vmul.f32 0.5, %v389_v36  ;;  %v341_v20 = vadd.f32 %v340_v42, %v1555_v18 }
  0xab   :  { %v312_v25 = vpop.f32.mrf.mxu1  ;;  %v264_v32 = vadd.f32 %v263_v24, %v1553_v17 }
  0xac   :  { %v313_v33 = vadd.f32 %v312_v25, %v1555_v18  ;;  %1155 = vtanh.f32 %v393_v41  ;;  %v1601_v36 = vpack.c.bf16 %v341_v20, %v292_v19  ;;  %v1116_v19 = vld [vmem:[#allocation12 + $0x18] sm:$0xff] }
  0xae   :  { %v1561_v37 = vpack.c.bf16 %v313_v33, %v264_v32 }
  0xb0   :  { %v391_v43 = vunpack.c.l.bf16 %v1561_v37  ;;  %v293_v56 = vpop.f32.mrf.mxu2  ;;  %v392_v23 = vunpack.c.h.bf16 %v1561_v37 }
  0xb1   :  { %v342_v59 = vpop.f32.mrf.mxu3  ;;  %v294_v37 = vadd.f32 %v293_v56, %v1553_v17 }
  0xb2   :  { %v266_v26 = vpop.f32.mrf.mxu0  ;;  %v394_v49 = vmul.f32 0.5, %v391_v43  ;;  %v1156_v57 = vpop.eup %1155  ;;  %v1118_v43 = vld [vmem:[#allocation12 + $0x28] sm:$0xff] }
  0xb3   :  { %v315_v27 = vpop.f32.mrf.mxu1  ;;  %v267_v38 = vadd.f32 %v266_v26, %v1553_v17  ;;  %v397_v2 = vadd.f32 1.0, %v1156_v57 }
  0xb4   :  { %v316_v39 = vadd.f32 %v315_v27, %v1555_v18  ;;  %1157 = vtanh.f32 %v394_v49 }
  0xb5   :  { %v399_v10 = vmul.f32 0.5, %v397_v2 }
  0xb6   :  { %v1566_v45 = vpack.c.bf16 %v316_v39, %v267_v38  ;;  %v343_v38 = vadd.f32 %v342_v59, %v1555_v18  ;;  %v1117_v59 = vld [vmem:[#allocation12 + $0x20] sm:$0xff] }
  0xb8   :  { %v416_v50 = vunpack.c.l.bf16 %v1566_v45  ;;  %v296_v26 = vpop.f32.mrf.mxu2 }
  0xb9   :  { %v345_v27 = vpop.f32.mrf.mxu3 }
  0xba   :  { %v268_v28 = vpop.f32.mrf.mxu0  ;;  %v420_v60 = vmul.f32 0.5, %v416_v50  ;;  %v1158_v5 = vpop.eup %1157 }
  0xbb   :  { %v317_v29 = vpop.f32.mrf.mxu1  ;;  %v269_v51 = vadd.f32 %v268_v28, %v1553_v17  ;;  %v398_v14 = vadd.f32 1.0, %v1158_v5  ;;  %v1119_v28 = vld [vmem:[#allocation12 + $0x30] sm:$0xff]  ;;  %v346_v5 = vadd.f32 %v345_v27, %v1555_v18 }
  0xbc   :  { %v318_v52 = vadd.f32 %v317_v29, %v1555_v18  ;;  %1159 = vtanh.f32 %v420_v60  ;;  %726 = vmatpush.bf16.msrb.mxu3 %v1119_v28 }
  0xbd   :  { %1161 = vtanh.f32 %v390_v4  ;;  %v400_v33 = vmul.f32 0.5, %v398_v14  ;;  %v297_v4 = vadd.f32 %v296_v26, %v1553_v17 }
  0xbe   :  { %v1577_v61 = vpack.c.bf16 %v318_v52, %v269_v51  ;;  %v551_v51 = vunpack.c.l.bf16 %v1601_v36  ;;  %v1608_v52 = vpack.c.bf16 %v343_v38, %v294_v37 }
  0xbf   :  { %v402_v50 = vsub.f32 1.0, %v400_v33 }
  0xc0   :  { %v418_v6 = vunpack.c.l.bf16 %v1577_v61  ;;  %727 = vmatpush.bf16.msrb.mxu3 %v1118_v43  ;;  %v419_v57 = vunpack.c.h.bf16 %v1577_v61 }
  0xc1   :  { %v347_v61 = vpop.f32.mrf.mxu3 }
  0xc2   :  { %v271_v30 = vpop.f32.mrf.mxu0  ;;  %v421_v16 = vmul.f32 0.5, %v418_v6  ;;  %v1160_v29 = vpop.eup %1159 }
  0xc3   :  { %v320_v31 = vpop.f32.mrf.mxu1  ;;  %v272_v47 = vadd.f32 %v271_v30, %v1553_v17  ;;  %v401_v30 = vsub.f32 1.0, %v399_v10  ;;  %v1162_v39 = vpop.eup %1161  ;;  %v424_v40 = vadd.f32 1.0, %v1160_v29 }
  0xc4   :  { %v321_v48 = vadd.f32 %v320_v31, %v1555_v18  ;;  %728 = vmatpush.bf16.msrb.mxu3 %v1117_v59 }
  0xc5   :  { %v426_v56 = vmul.f32 0.5, %v424_v40  ;;  %v1115_v40 = vld [vmem:[#allocation12 + $0x10] sm:$0xff] }
  0xc6   :  { %v1573_v53 = vpack.c.bf16 %v321_v48, %v272_v47  ;;  %v407_v47 = vmul.f32 0.0, %v399_v10 }
  0xc7   :  { %v428_v14 = vsub.f32 1.0, %v426_v56 }
  0xc8   :  { %v443_v63 = vunpack.c.l.bf16 %v1573_v53  ;;  %729 = vmatpush.bf16.msrb.mxu3 %v1116_v19 }
  0xca   :  { %v273_v34 = vpop.f32.mrf.mxu0  ;;  %v447_v7 = vmul.f32 0.5, %v443_v63  ;;  %v444_v63 = vunpack.c.h.bf16 %v1573_v53 }
  0xcb   :  { %v322_v35 = vpop.f32.mrf.mxu1  ;;  %v274_v0 = vadd.f32 %v273_v34, %v1553_v17  ;;  %v417_v34 = vunpack.c.h.bf16 %v1566_v45 }
  0xcc   :  { %v323_v1 = vadd.f32 %v322_v35, %v1555_v18  ;;  %1163 = vtanh.f32 %v447_v7  ;;  %v298_v7 = vpop.f32.mrf.mxu2  ;;  %730 = vmatpush.bf16.msrb.mxu3 %v1115_v40 }
  0xcd   :  { %1165 = vtanh.f32 %v421_v16 }
  0xce   :  { %v1585_v8 = vpack.c.bf16 %v323_v1, %v274_v0  ;;  %1167 = vtanh.f32 %v392_v23 }
  0xd0   :  { %v445_v24 = vunpack.c.l.bf16 %v1585_v8 }
  0xd2   :  { %v276_v44 = vpop.f32.mrf.mxu0  ;;  %v448_v41 = vmul.f32 0.5, %v445_v24 }
  0xd3   :  { %v325_v46 = vpop.f32.mrf.mxu1  ;;  %v277_v54 = vadd.f32 %v276_v44, %v1553_v17  ;;  %v405_v44 = vmul.f32 %v1162_v39, %v401_v30 }
  0xd4   :  { %v326_v55 = vadd.f32 %v325_v46, %v1555_v18  ;;  %v1164_v46 = vpop.eup %1163 }
  0xd5   :  { %v1166_v60 = vpop.eup %1165  ;;  %v451_v0 = vadd.f32 1.0, %v1164_v46 }
  0xd6   :  { %v1582_v3 = vpack.c.bf16 %v326_v55, %v277_v54  ;;  %v1168_v2 = vpop.eup %1167 }
  0xd7   :  { %v406_v10 = vmul.f32 %v1168_v2, %v402_v50  ;;  %v453_v20 = vmul.f32 0.5, %v451_v0 }
  0xd8   :  { %v470_v11 = vunpack.c.l.bf16 %v1582_v3  ;;  %v471_v28 = vunpack.c.h.bf16 %v1582_v3 }
  0xda   :  { %v278_v58 = vpop.f32.mrf.mxu0  ;;  %v474_v31 = vmul.f32 0.5, %v470_v11  ;;  %v408_v11 = vmul.f32 0.0, %v400_v33 }
  0xdb   :  { %v327_v62 = vpop.f32.mrf.mxu1  ;;  %v279_v12 = vadd.f32 %v278_v58, %v1553_v17 }
  0xdc   :  { %v328_v13 = vadd.f32 %v327_v62, %v1555_v18  ;;  %1169 = vtanh.f32 %v474_v31  ;;  %v409_v62 = vadd.f32 %v407_v47, %v405_v44 }
  0xdd   :  { %1171 = vtanh.f32 %v417_v34 }
  0xde   :  { %v1596_v32 = vpack.c.bf16 %v328_v13, %v279_v12  ;;  %1173 = vtanh.f32 %v448_v41  ;;  %v555_v12 = vmul.f32 0.5, %v551_v51  ;;  %v553_v13 = vunpack.c.l.bf16 %v1608_v52 }
  0xdf   :  { %v434_v37 = vmul.f32 %v426_v56, %v409_v62  ;;  %v455_v41 = vsub.f32 1.0, %v453_v20 }
  0xe0   :  { %v472_v45 = vunpack.c.l.bf16 %v1596_v32  ;;  %v556_v29 = vmul.f32 0.5, %v553_v13 }
  0xe2   :  { %v281_v15 = vpop.f32.mrf.mxu0  ;;  %v475_v1 = vmul.f32 0.5, %v472_v45  ;;  %v1170_v9 = vpop.eup %1169 }
  0xe3   :  { %v282_v21 = vadd.f32 %v281_v15, %v1553_v17  ;;  %v330_v22 = vpop.f32.mrf.mxu1  ;;  %v1172_v53 = vpop.eup %1171  ;;  %v425_v15 = vadd.f32 1.0, %v1166_v60  ;;  %v478_v24 = vadd.f32 1.0, %v1170_v9 }
  0xe4   :  { %v331_v25 = vadd.f32 %v330_v22, %v1555_v18  ;;  %v348_v22 = vadd.f32 %v347_v61, %v1555_v18  ;;  %v1174_v23 = vpop.eup %1173  ;;  %v432_v34 = vmul.f32 %v1172_v53, %v428_v14  ;;  %v1113_v53 = vld [vmem:[#allocation12] sm:$0xff] }
  0xe5   :  { %v427_v38 = vmul.f32 0.5, %v425_v15  ;;  %v452_v43 = vadd.f32 1.0, %v1174_v23  ;;  %v480_v3 = vmul.f32 0.5, %v478_v24 }
  0xe6   :  { %v1599_v35 = vpack.c.bf16 %v331_v25, %v282_v21  ;;  %v299_v21 = vadd.f32 %v298_v7, %v1553_v17  ;;  %v1622_v25 = vpack.c.bf16 %v346_v5, %v297_v4 }
  0xe7   :  { %v454_v60 = vmul.f32 0.5, %v452_v43  ;;  %v482_v0 = vsub.f32 1.0, %v480_v3 }
  0xe8   :  { %v497_v42 = vunpack.c.l.bf16 %v1599_v35  ;;  %v1628_v44 = vpack.c.bf16 %v348_v22, %v299_v21  ;;  %v578_v46 = vunpack.c.l.bf16 %v1622_v25  ;;  %v498_v50 = vunpack.c.h.bf16 %v1599_v35 }
  0xea   :  { %v501_v48 = vmul.f32 0.5, %v497_v42  ;;  %v283_v49 = vpop.f32.mrf.mxu0  ;;  %v446_v42 = vunpack.c.h.bf16 %v1585_v8  ;;  %v436_v8 = vadd.f32 %v434_v37, %v432_v34  ;;  %v580_v62 = vunpack.c.l.bf16 %v1628_v44 }
  0xeb   :  { %v284_v54 = vadd.f32 %v283_v49, %v1553_v17  ;;  %v332_v55 = vpop.f32.mrf.mxu1  ;;  %v410_v49 = vadd.f32 %v408_v11, %v406_v10  ;;  %v582_v2 = vmul.f32 0.5, %v578_v46  ;;  %v1127_v46 = vld [vmem:[#allocation13 + $0x30] sm:$0xff] }
  0xec   :  { %v333_v58 = vadd.f32 %v332_v55, %v1555_v18  ;;  %1175 = vtanh.f32 %v501_v48  ;;  %v429_v55 = vsub.f32 1.0, %v427_v38  ;;  %v461_v5 = vmul.f32 %v453_v20, %v436_v8 }
  0xed   :  { %1177 = vtanh.f32 %v419_v57  ;;  %v1114_v57 = vld [vmem:[#allocation12 + $0x8] sm:$0xff]  ;;  %v435_v11 = vmul.f32 %v427_v38, %v410_v49  ;;  %v583_v21 = vmul.f32 0.5, %v580_v62 }
  0xee   :  { %v1616_v6 = vpack.c.bf16 %v333_v58, %v284_v54  ;;  %1179 = vtanh.f32 %v475_v1  ;;  %731 = vmatpush.bf16.msrb.mxu3 %v1114_v57 }
  0xef   :  { %1181 = vtanh.f32 %v444_v63  ;;  %v641_v63 = vpop.f32.mrf.mxu2 }
  0xf0   :  { %v499_v16 = vunpack.c.l.bf16 %v1616_v6  ;;  %1183 = vtanh.f32 %v555_v12  ;;  %v473_v12 = vunpack.c.h.bf16 %v1596_v32  ;;  %v500_v32 = vunpack.c.h.bf16 %v1616_v6 }
  0xf2   :  { %v502_v26 = vmul.f32 0.5, %v499_v16  ;;  %v286_v27 = vpop.f32.mrf.mxu0  ;;  %v1176_v33 = vpop.eup %1175  ;;  %v456_v16 = vsub.f32 1.0, %v454_v60  ;;  %732 = vmatpush.bf16.msrb.mxu3 %v1113_v53 }
  0xf3   :  { %v287_v30 = vadd.f32 %v286_v27, %v1553_v17  ;;  %v335_v31 = vpop.f32.mrf.mxu1  ;;  %v1178_v45 = vpop.eup %1177  ;;  %v505_v51 = vadd.f32 1.0, %v1176_v33 }
  0xf4   :  { %v336_v39 = vadd.f32 %v335_v31, %v1555_v18  ;;  %1185 = vtanh.f32 %v502_v26  ;;  %v1180_v48 = vpop.eup %1179  ;;  %v433_v15 = vmul.f32 %v1178_v45, %v429_v55  ;;  %v1151_v31 = vld [vmem:[%s1671_s4] ss:$0 sm:$0xff] }
  0xf5   :  { %1187 = vtanh.f32 %v471_v28  ;;  %v1182_v54 = vpop.eup %1181  ;;  %v479_v1 = vadd.f32 1.0, %v1180_v48  ;;  %v507_v7 = vmul.f32 0.5, %v505_v51  ;;  %v554_v48 = vunpack.c.h.bf16 %v1608_v52  ;;  %v1126_v52 = vld [vmem:[#allocation13 + $0x28] sm:$0xff] }
  0xf6   :  { %v1631_v47 = vpack.c.bf16 %v336_v39, %v287_v30  ;;  %1189 = vtanh.f32 %v556_v29  ;;  %v1184_v58 = vpop.eup %1183  ;;  %v459_v59 = vmul.f32 %v1182_v54, %v455_v41  ;;  %v552_v29 = vunpack.c.h.bf16 %v1601_v36  ;;  %v1128_v39 = vld [vmem:[#allocation13 + $0x38] sm:$0xff] }
  0xf7   :  { %1191 = vtanh.f32 %v446_v42  ;;  %v481_v23 = vmul.f32 0.5, %v479_v1  ;;  %v509_v27 = vsub.f32 1.0, %v507_v7  ;;  %v437_v34 = vadd.f32 %v435_v11, %v433_v15  ;;  %810 = vmatpush.bf16.msra.mxu2 %v1128_v39 }
  0xf8   :  { %v524_v56 = vunpack.c.l.bf16 %v1631_v47  ;;  %1193 = vtanh.f32 %v498_v50  ;;  %v463_v19 = vadd.f32 %v461_v5, %v459_v59  ;;  %v525_v24 = vunpack.c.h.bf16 %v1631_v47 }
  0xf9   :  { %v559_v38 = vadd.f32 1.0, %v1184_v58  ;;  %v483_v41 = vsub.f32 1.0, %v481_v23  ;;  %v462_v47 = vmul.f32 %v454_v60, %v437_v34  ;;  %v642_v49 = vadd.f32 %v1151_v31, %v641_v63 }
  0xfa   :  { %v528_v4 = vmul.f32 0.5, %v524_v56  ;;  %v288_v35 = vpop.f32.mrf.mxu0  ;;  %v1186_v10 = vpop.eup %1185  ;;  %v488_v28 = vmul.f32 %v480_v3, %v463_v19  ;;  %v579_v54 = vunpack.c.h.bf16 %v1622_v25  ;;  %v1125_v19 = vld [vmem:[#allocation13 + $0x20] sm:$0xff] }
  0xfb   :  { %v289_v61 = vadd.f32 %v288_v35, %v1553_v17  ;;  %v337_v9 = vpop.f32.mrf.mxu1  ;;  %v1188_v14 = vpop.eup %1187  ;;  %v561_v56 = vmul.f32 0.5, %v559_v38  ;;  %811 = vmatpush.bf16.msra.mxu2 %v1127_v46  ;;  %v646_v35 = vmul.f32 0.5, %v642_v49 }
  0xfc   :  { %1195 = vtanh.f32 %v528_v4  ;;  %v338_v13 = vadd.f32 %v337_v9, %v1555_v18  ;;  %v1190_v22 = vpop.eup %1189  ;;  %v486_v20 = vmul.f32 %v1188_v14, %v482_v0  ;;  %v506_v18 = vadd.f32 1.0, %v1186_v10  ;;  %v643_v3 = vpop.f32.mrf.mxu2 }
  0xfd   :  { %v1192_v26 = vpop.eup %1191  ;;  %1197 = vtanh.f32 %v582_v2  ;;  %v644_v59 = vadd.f32 %v1151_v31, %v643_v3  ;;  %v560_v4 = vadd.f32 1.0, %v1190_v22  ;;  %v563_v10 = vsub.f32 1.0, %v561_v56 }
  0xfe   :  { %v1640_v17 = vpack.c.bf16 %v338_v13, %v289_v61  ;;  %1199 = vtanh.f32 %v473_v12  ;;  %v1194_v33 = vpop.eup %1193  ;;  %v460_v37 = vmul.f32 %v1192_v26, %v456_v16  ;;  %v490_v6 = vadd.f32 %v488_v28, %v486_v20 }
  0xff   :  { %1201 = vtanh.f32 %v583_v21  ;;  %v513_v43 = vmul.f32 %v1194_v33, %v509_v27  ;;  %v508_v36 = vmul.f32 0.5, %v506_v18  ;;  %v647_v12 = vmul.f32 0.5, %v644_v59  ;;  %812 = vmatpush.bf16.msra.mxu2 %v1126_v52  ;;  %v1124_v59 = vld [vmem:[#allocation13 + $0x18] sm:$0xff]  ;;  %v1134_v52 = vld [vmem:[#allocation15 + $0x28] sm:$0xff] }
 0x100   :  { %v526_v30 = vunpack.c.l.bf16 %v1640_v17  ;;  %1203 = vtanh.f32 %v525_v24  ;;  %v515_v51 = vmul.f32 %v507_v7, %v490_v6  ;;  %v464_v57 = vadd.f32 %v462_v47, %v460_v37 }
 0x101   :  { %1205 = vtanh.f32 %v500_v32  ;;  %v527_v58 = vunpack.c.h.bf16 %v1640_v17  ;;  %v510_v1 = vsub.f32 1.0, %v508_v36  ;;  %v562_v21 = vmul.f32 0.5, %v560_v4 }
 0x102   :  { %v1196_v40 = vpop.eup %1195  ;;  %v529_v42 = vmul.f32 0.5, %v526_v30  ;;  %v517_v60 = vadd.f32 %v515_v51, %v513_v43  ;;  %v489_v25 = vmul.f32 %v481_v23, %v464_v57  ;;  %v581_v22 = vunpack.c.h.bf16 %v1628_v44 }
 0x103   :  { %v532_v45 = vadd.f32 1.0, %v1196_v40  ;;  %v1198_v50 = vpop.eup %1197  ;;  %813 = vmatpush.bf16.msra.mxu2 %v1125_v19  ;;  %v564_v31 = vsub.f32 1.0, %v562_v21 }
 0x104   :  { %1207 = vtanh.f32 %v529_v42  ;;  %v1200_v8 = vpop.eup %1199  ;;  %v586_v11 = vadd.f32 1.0, %v1198_v50 }
 0x105   :  { %1209 = vtanh.f32 %v552_v29  ;;  %v534_v55 = vmul.f32 0.5, %v532_v45  ;;  %v1202_v62 = vpop.eup %1201  ;;  %v487_v0 = vmul.f32 %v1200_v8, %v483_v41 }
 0x106   :  { %v1204_v63 = vpop.eup %1203  ;;  %1211 = vtanh.f32 %v554_v48  ;;  %v587_v23 = vadd.f32 1.0, %v1202_v62  ;;  %v588_v18 = vmul.f32 0.5, %v586_v11  ;;  %v1123_v62 = vld [vmem:[#allocation13 + $0x10] sm:$0xff]  ;;  %v1132_v11 = vld [vmem:[#allocation15 + $0x18] sm:$0xff] }
 0x107   :  { %v536_v2 = vsub.f32 1.0, %v534_v55  ;;  %v1206_v5 = vpop.eup %1205  ;;  %1213 = vtanh.f32 %v579_v54  ;;  %v542_v61 = vmul.f32 %v534_v55, %v517_v60  ;;  %v491_v53 = vadd.f32 %v489_v25, %v487_v0  ;;  %814 = vmatpush.bf16.msra.mxu2 %v1124_v59  ;;  %v1122_v0 = vld [vmem:[#allocation13 + $0x8] sm:$0xff]  ;;  %v1136_v60 = vld [vmem:[#allocation15 + $0x38] sm:$0xff] }
 0x108   :  { %1215 = vtanh.f32 %v527_v58  ;;  %v514_v14 = vmul.f32 %v1206_v5, %v510_v1  ;;  %v589_v33 = vmul.f32 0.5, %v587_v23  ;;  %v590_v39 = vsub.f32 1.0, %v588_v18  ;;  %v1121_v1 = vld [vmem:[#allocation13] sm:$0xff]  ;;  %895 = vmatpush.bf16.msra.mxu3 %v1136_v60 }
 0x109   :  { %v540_v7 = vmul.f32 %v1204_v63, %v536_v2  ;;  %1217 = vtanh.f32 %v646_v35  ;;  %v516_v20 = vmul.f32 %v508_v36, %v491_v53  ;;  %v1135_v2 = vld [vmem:[#allocation15 + $0x30] sm:$0xff]  ;;  %v1133_v63 = vld [vmem:[#allocation15 + $0x20] sm:$0xff] }
 0x10a   :  { %v1208_v9 = vpop.eup %1207  ;;  %1219 = vtanh.f32 %v647_v12  ;;  %v591_v42 = vsub.f32 1.0, %v589_v33  ;;  %v1152_v35 = vld [vmem:[%s1673_s6] ss:$0 sm:$0xff]  ;;  %v1131_v12 = vld [vmem:[#allocation15 + $0x10] sm:$0xff] }
 0x10b   :  { %v1210_v13 = vpop.eup %1209  ;;  %v544_v15 = vadd.f32 %v542_v61, %v540_v7  ;;  %v533_v16 = vadd.f32 1.0, %v1208_v9  ;;  %v518_v28 = vadd.f32 %v516_v20, %v514_v14  ;;  %1221 = vtanh.f32 %v581_v22  ;;  %815 = vmatpush.bf16.msra.mxu2 %v1123_v62  ;;  %v1129_v53 = vld [vmem:[#allocation15] sm:$0xff] }
 0x10c   :  { %v1212_v26 = vpop.eup %1211  ;;  %v567_v32 = vmul.f32 %v1210_v13, %v563_v10  ;;  %896 = vmatpush.bf16.msra.mxu3 %v1135_v2  ;;  %v1130_v13 = vld [vmem:[#allocation15 + $0x8] sm:$0xff] }
 0x10d   :  { %v535_v24 = vmul.f32 0.5, %v533_v16  ;;  %v569_v17 = vmul.f32 %v561_v56, %v544_v15  ;;  %v1214_v27 = vpop.eup %1213  ;;  %v568_v6 = vmul.f32 %v1212_v26, %v564_v31  ;;  %v1153_v15 = vld [vmem:[%s1675_s8] ss:$0 sm:$0xff]  ;;  %s917_s8 = sshll.u32 %s1678_s11, 4  ;;  %s918_s8 = int_to_ptr.hbm [resolvable:$true] %s917_s8 }
 0x10e   :  { %v1216_v30 = vpop.eup %1215  ;;  %v594_v46 = vmul.f32 %v1214_v27, %v590_v39 }
 0x10f   :  { %v537_v29 = vsub.f32 1.0, %v535_v24  ;;  %v543_v37 = vmul.f32 %v535_v24, %v518_v28  ;;  %v571_v44 = vadd.f32 %v569_v17, %v567_v32  ;;  %v1218_v38 = vpop.eup %1217  ;;  %816 = vmatpush.bf16.msra.mxu2 %v1122_v0  ;;  %v1154_v24 = vld [vmem:[%s1677_s10] ss:$0 sm:$0xff] }
 0x110   :  { %v1220_v41 = vpop.eup %1219  ;;  %v650_v36 = vadd.f32 1.0, %v1218_v38  ;;  %897 = vmatpush.bf16.msra.mxu3 %v1134_v52 }
 0x111   :  { %v541_v34 = vmul.f32 %v1216_v30, %v537_v29  ;;  %v596_v43 = vmul.f32 %v588_v18, %v571_v44  ;;  %v1222_v3 = vpop.eup %1221  ;;  %v651_v48 = vadd.f32 1.0, %v1220_v41 }
 0x112   :  { %v652_v50 = vmul.f32 0.5, %v650_v36  ;;  %v595_v51 = vmul.f32 %v1222_v3, %v591_v42 }
 0x113   :  { %v545_v40 = vadd.f32 %v543_v37, %v541_v34  ;;  %v598_v49 = vadd.f32 %v596_v43, %v594_v46  ;;  %v653_v8 = vmul.f32 0.5, %v651_v48  ;;  %817 = vmatpush.bf16.msra.mxu2 %v1121_v1 }
 0x114   :  { %898 = vmatpush.bf16.msra.mxu3 %v1133_v63 }
 0x115   :  { %v570_v45 = vmul.f32 %v562_v21, %v545_v40  ;;  %v654_v56 = vmul.f32 %v652_v50, %v598_v49 }
 0x117   :  { %v572_v47 = vadd.f32 %v570_v45, %v568_v6 }
 0x118   :  { %899 = vmatpush.bf16.msra.mxu3 %v1132_v11 }
 0x119   :  { %v597_v54 = vmul.f32 %v589_v33, %v572_v47 }
 0x11b   :  { %v599_v55 = vadd.f32 %v597_v54, %v595_v51 }
 0x11c   :  { %900 = vmatpush.bf16.msra.mxu3 %v1131_v12 }
 0x11d   :  { %v655_v57 = vmul.f32 %v653_v8, %v599_v55 }
 0x11f   :  { %v656_v58 = vpack.c.bf16 %v655_v57, %v654_v56 }
 0x120   :  { %901 = vmatpush.bf16.msra.mxu3 %v1130_v13 }
 0x121   :  { %733 = vmatmul.bf16.vlgmr.msrb.gmra.mxu3 %v656_v58 }
 0x124   :  { %902 = vmatpush.bf16.msra.mxu3 %v1129_v53 }
 0x1a4   :  { %v734_v4 = vpop.f32.mrf.mxu3 }
 0x1a5   :  { %v735_v5 = vadd.f32 %v1152_v35, %v734_v4 }
 0x1a7   :  { %v739_v61 = vmax.f32 %v735_v5, 0.0 }
 0x1ac   :  { %v736_v25 = vpop.f32.mrf.mxu3 }
 0x1ad   :  { %v737_v7 = vadd.f32 %v1152_v35, %v736_v25 }
 0x1af   :  { %v740_v9 = vmax.f32 %v737_v7, 0.0 }
 0x1b1   :  { %v741_v10 = vpack.c.bf16 %v740_v9, %v739_v61 }
 0x1b3   :  { %818 = vmatmul.bf16.vlgmr.msra.gmra.mxu2 %v741_v10 }
 0x236   :  { %v819_v14 = vpop.f32.mrf.mxu2 }
 0x237   :  { %v820_v16 = vadd.f32 %v1153_v15, %v819_v14 }
 0x239   :  { %v824_v22 = vmax.f32 %v820_v16, 0.0 }
 0x23e   :  { %v821_v19 = vpop.f32.mrf.mxu2 }
 0x23f   :  { %v822_v21 = vadd.f32 %v1153_v15, %v821_v19 }
 0x241   :  { %v825_v20 = vmax.f32 %v822_v21, 0.0 }
 0x243   :  { %v826_v23 = vpack.c.bf16 %v825_v20, %v824_v22 }
 0x245   :  { %903 = vmatmul.bf16.vlgmr.msra.gmra.mxu3 %v826_v23 }
 0x2c8   :  { %v904_v17 = vpop.f32.mrf.mxu3 }
 0x2c9   :  { %v905_v26 = vadd.f32 %v1154_v24, %v904_v17 }
 0x2cb   :  { %909 = vst [vmem:[#allocation16] sm:$0xff] %v905_v26 }
 0x2d0   :  { %v906_v27 = vpop.f32.mrf.mxu3 }
 0x2d1   :  { %v907_v32 = vadd.f32 %v1154_v24, %v906_v27 }
 0x2d3   :  { %910 = vst [vmem:[#allocation16 + $0x8] sm:$0xff] %v907_v32 }
 0x2d4   :  { %923 = dma.vmem_to_hbm [thread:$0]  %s916_s7, 256, %s918_s8, [#allocation6], %s1426_s22, %s1426_s22, %s1427_s23  }
 0x2d5   :  { %1423 = dma.done.wait [#allocation6], 256  }
 0x2d6   :  { %1424 = vsyncadd [#allocation6], 4294967040 }
 0x2d7   :  { %928 = vsyncpa [#allocation5], 1 }
 0x2d8   :  { %929 = vsyncpa [#allocation8], 1 }
 0x2d9   :  { %930 = vsyncpa [#allocation11], 1 }
 0x2da   :  { %931 = vsyncpa [#allocation14], 1 }
 0x2db   :  { %932 = vsyncpa [#allocation6], 1 }

</bundles_post_ra>
